<compile_context>
chip_gen: v6e
topology: v6e:2x2x1
jax: 0.10.0
libtpu: 0.0.40
codegen_flags: <defaults>
</compile_context>

<pallas_src>
import jax
import jax.numpy as jnp
from jax.experimental import pallas as pl
from jax.experimental.pallas import tpu as pltpu

LEAKY_SLOPE = 0.01  # F.leaky_relu default negative_slope


def _round_up(n, m):
    return ((n + m - 1) // m) * m


def _leaky_relu(x):
    # For slope in (0, 1): max(x, slope*x) == leaky_relu(x); mul+max beats cmp+select.
    return jnp.maximum(x, LEAKY_SLOPE * x)


# -----------------------------------------------------------------------------
# Kernel: one batch tile of TB columns.  Activations are (hidden, TB):
#   features on sublanes, batch on lanes (lane-dense compute and store).
#
#   xt_ref : (K1, TB)   f32, K1 = round_up(in_size, 8); rows >= in_size are zero
#   w_ref  : (3, hidden, hidden) f32, transposed fc2..fc4 weights (resident)
#   aux_ref: (hidden, K1 + 8)    f32:
#              cols 0..K1-1 = fc1 weight^T (zero-padded), K1..K1+3 = b1..b4,
#              K1+4 = fc5 weight column,   K1+5 = fc5 bias (replicated)
# -----------------------------------------------------------------------------
def dqn_kernel(xt_ref, w_ref, aux_ref, out_ref):
    k1 = xt_ref.shape[0]
    aux = aux_ref[...]                                   # (hidden, K1+8)

    # fc1: f32 matmul with tiny K (<=8); zero-padded rows/cols are consistent.
    h = jnp.dot(aux[:, :k1], xt_ref[...], preferred_element_type=jnp.float32)
    h = _leaky_relu(h + aux[:, k1:k1 + 1])

    # fc2..fc4: bf16 MXU operands (single-pass), f32 accumulation,
    # f32 bias-add + leaky_relu on the VPU.
    for l in range(3):                                   # static unroll
        z = jnp.dot(w_ref[l].astype(jnp.bfloat16), h.astype(jnp.bfloat16),
                    preferred_element_type=jnp.float32)
        h = _leaky_relu(z + aux[:, k1 + 1 + l:k1 + 2 + l])

    # fc5 (hidden -> 1): VPU multiply + XLU sublane reduce; (1, TB) lane-dense.
    w5 = aux[:, k1 + 4:k1 + 5]                           # (hidden, 1)
    b5 = aux[0:1, k1 + 5:k1 + 6]                         # (1, 1)
    out = jnp.sum(h * w5, axis=0, keepdims=True) + b5
    out_ref[...] = out.astype(out_ref.dtype)


# -----------------------------------------------------------------------------
# Parameter packing (done once, outside the hot path): 10 arrays -> 2 slabs.
# Weights are stored transposed ((out, in)) so the kernel computes W^T @ x^T.
# -----------------------------------------------------------------------------
def pack_dqn_params(params):
    ws = [params[2 * i] for i in range(5)]       # (in, out) layout
    bs = [params[2 * i + 1] for i in range(5)]   # (1, out)
    in_size, hidden = ws[0].shape
    assert hidden % 8 == 0, "hidden must be a multiple of 8 (sublane tiling)"
    K1 = _round_up(in_size, 8)

    # fc2..fc4 transposed weights, kept f32 in HBM (tiny, resident); the kernel
    # casts operands to bf16 at matmul time.
    w_stack = jnp.stack([ws[1].T, ws[2].T, ws[3].T], axis=0).astype(jnp.float32)

    aux = jnp.zeros((hidden, K1 + 8), jnp.float32)
    aux = aux.at[:, :in_size].set(ws[0].T.astype(jnp.float32))             # fc1 W^T
    aux = aux.at[:, K1 + 0].set(bs[0][0])
    aux = aux.at[:, K1 + 1].set(bs[1][0])
    aux = aux.at[:, K1 + 2].set(bs[2][0])
    aux = aux.at[:, K1 + 3].set(bs[3][0])
    aux = aux.at[:, K1 + 4].set(ws[4][:, 0])                               # fc5 W col
    aux = aux.at[:, K1 + 5].set(jnp.full((hidden,), bs[4][0, 0], jnp.float32))
    return w_stack, aux


# -----------------------------------------------------------------------------
# Wrapper: batch grid + lane-dense layout plumbing.
# -----------------------------------------------------------------------------
def dqn_forward(x, w_stack, aux, *, tb_target=2048):
    """x: (B, in_size) float32 -> (B, 1) float32."""
    B, in_size = x.shape
    hidden = w_stack.shape[-1]
    K1 = _round_up(in_size, 8)

    # Batch-tile policy:
    #   * lane dim always padded to a multiple of 128 (unmasked loads/stores),
    #   * TB capped so the grid has >= 2 steps when the batch allows it,
    #     so ("parallel",) can shard across both v7x TensorCores.
    B_pad0 = _round_up(B, 128)
    tb_max = _round_up(tb_target, 128)
    if B_pad0 > 128:
        TB = min(tb_max, _round_up((B_pad0 + 1) // 2, 128))
    else:
        TB = 128
    B_pad = _round_up(B, TB)
    G = B_pad // TB

    # x transposed into feature-major layout, zero-padded only to K1=8 sublanes
    # (4x less input traffic than padding to hidden).
    xt = jnp.zeros((K1, B_pad), jnp.float32).at[:in_size, :B].set(
        x.T.astype(jnp.float32))
    # TODO(synk): for very large B the ideal path feeds (TB, in_size) blocks and
    # transposes in-kernel on the XLU to avoid this HBM round trip.

    out = pl.pallas_call(
        dqn_kernel,
        out_shape=jax.ShapeDtypeStruct((1, B_pad), jnp.float32),
        grid=(G,),
        in_specs=[
            pl.BlockSpec((K1, TB), lambda i: (0, i)),          # x^T batch tile
            pl.BlockSpec(w_stack.shape, lambda i: (0, 0, 0)),  # fc2..fc4 weights (resident)
            pl.BlockSpec(aux.shape, lambda i: (0, 0)),         # fc1 W + biases + fc5
        ],
        out_specs=pl.BlockSpec((1, TB), lambda i: (0, i)),     # lane-dense output
        compiler_params=pltpu.CompilerParams(
            dimension_semantics=("parallel",)),                # 2x on v7x megacore
    )(xt, w_stack, aux)

    return out[0, :B][:, None]                                 # back to (B, 1)


# -----------------------------------------------------------------------------
# Init + pure-JAX reference (PyTorch nn.Linear semantics).
# -----------------------------------------------------------------------------
def init_dqn_params(key, in_size, hidden):
    """Deterministic init mimicking nn.Linear default (U[-1/sqrt(fan_in), +])."""
    dims = [(in_size, hidden), (hidden, hidden), (hidden, hidden),
            (hidden, hidden), (hidden, 1)]
    params = []
    for (fan_in, fan_out) in dims:
        key, kw, kb = jax.random.split(key, 3)
        bound = 1.0 / jnp.sqrt(jnp.float32(fan_in))
        w = jax.random.uniform(kw, (fan_in, fan_out), jnp.float32, -bound, bound)
        b = jax.random.uniform(kb, (1, fan_out), jnp.float32, -bound, bound)
        params += [w, b]
    return params


def dqn_reference(x, params):
    h = x
    for i in range(4):
        w, b = params[2 * i], params[2 * i + 1]
        h = jnp.where(h @ w + b >= 0, h @ w + b, LEAKY_SLOPE * (h @ w + b))
    w, b = params[8], params[9]
    return h @ w + b


if __name__ == "__main__":
    key = jax.random.PRNGKey(0)
    in_size, hidden, batch = 4, 32, 8

    kx, kp = jax.random.split(key)
    x = jax.random.normal(kx, (batch, in_size), jnp.float32)
    params = init_dqn_params(kp, in_size, hidden)
    w_stack, aux = pack_dqn_params(params)

    # Tolerances are loosened vs. a pure-f32 kernel because fc2..fc4 use bf16
    # MXU operands (f32 accumulation); typical error is ~1e-3 at hidden=32.
    ATOL = RTOL = 2e-2

    # Small single-block case.
    out = jax.block_until_ready(dqn_forward(x, w_stack, aux))
    ref = dqn_reference(x, params)
    assert out.shape == (batch, 1)
    assert jnp.allclose(out, ref, atol=ATOL, rtol=RTOL)

    # Multi-block grid case (exercises batch tiling, 128-padding, >=2 grid steps).
    batch2 = 200
    x2 = jax.random.normal(jax.random.PRNGKey(1), (batch2, in_size), jnp.float32)
    out2 = jax.block_until_ready(dqn_forward(x2, w_stack, aux, tb_target=128))
    ref2 = dqn_reference(x2, params)
    assert out2.shape == (batch2, 1)
    assert jnp.allclose(out2, ref2, atol=ATOL, rtol=RTOL)

    print("KERNEL_OK")
</pallas_src>

<mosaic_0001>
module attributes {stable_mosaic.version = 11 : i64} {
  func.func @dqn_kernel(%arg0: i32, %arg1: memref<8x128xf32, #tpu.memory_space<vmem>>, %arg2: memref<3x32x32xf32, #tpu.memory_space<vmem>>, %arg3: memref<32x16xf32, #tpu.memory_space<vmem>>, %arg4: memref<1x128xf32, #tpu.memory_space<vmem>>) attributes {dimension_semantics = [#tpu.dimension_semantics<parallel>], iteration_bounds = array<i64: 1>, scalar_prefetch = 0 : i64, scratch_operands = 0 : i64, tpu.core_type = #tpu.core_type<tc>, window_params = [{transform_indices = @transform_0, window_bounds = array<i64: 8, 128>}, {pipeline_mode = #tpu.pipeline_mode<synchronous>, transform_indices = @transform_1, window_bounds = array<i64: 3, 32, 32>}, {pipeline_mode = #tpu.pipeline_mode<synchronous>, transform_indices = @transform_2, window_bounds = array<i64: 32, 16>}, {transform_indices = @transform_3, window_bounds = array<i64: 1, 128>}]} {
    %c0 = arith.constant 0 : index
    %c0_0 = arith.constant 0 : index
    %0 = vector.load %arg3[%c0, %c0_0] : memref<32x16xf32, #tpu.memory_space<vmem>>, vector<32x16xf32>
    %1 = vector.extract_strided_slice %0 {offsets = [0, 0], sizes = [32, 8], strides = [1, 1]} : vector<32x16xf32> to vector<32x8xf32>
    %c0_1 = arith.constant 0 : index
    %c0_2 = arith.constant 0 : index
    %2 = vector.load %arg1[%c0_1, %c0_2] : memref<8x128xf32, #tpu.memory_space<vmem>>, vector<8x128xf32>
    %cst = arith.constant dense<0.000000e+00> : vector<32x128xf32>
    %3 = tpu.matmul %1, %2, %cst {dimension_numbers = #tpu.dot_dimension_numbers<[1], [0], [0], [1], [0, 0, 1, 1], [], []>} : vector<32x8xf32>, vector<8x128xf32>, vector<32x128xf32> -> vector<32x128xf32>
    %4 = vector.extract_strided_slice %0 {offsets = [0, 8], sizes = [32, 1], strides = [1, 1]} : vector<32x16xf32> to vector<32x1xf32>
    %5 = vector.broadcast %4 : vector<32x1xf32> to vector<32x128xf32>
    %6 = arith.addf %3, %5 : vector<32x128xf32>
    %cst_3 = arith.constant 0.00999999977 : f32
    %7 = vector.broadcast %cst_3 : f32 to vector<32x128xf32>
    %8 = arith.mulf %7, %6 : vector<32x128xf32>
    %9 = arith.maximumf %6, %8 : vector<32x128xf32>
    %c0_4 = arith.constant 0 : index
    %c0_5 = arith.constant 0 : index
    %c0_6 = arith.constant 0 : index
    %10 = vector.load %arg2[%c0_4, %c0_5, %c0_6] : memref<3x32x32xf32, #tpu.memory_space<vmem>>, vector<1x32x32xf32>
    %11 = vector.shape_cast %10 : vector<1x32x32xf32> to vector<32x32xf32>
    %12 = arith.truncf %11 : vector<32x32xf32> to vector<32x32xbf16>
    %13 = arith.truncf %9 : vector<32x128xf32> to vector<32x128xbf16>
    %cst_7 = arith.constant dense<0.000000e+00> : vector<32x128xf32>
    %14 = tpu.matmul %12, %13, %cst_7 {dimension_numbers = #tpu.dot_dimension_numbers<[1], [0], [0], [1], [0, 0, 1, 1], [], []>} : vector<32x32xbf16>, vector<32x128xbf16>, vector<32x128xf32> -> vector<32x128xf32>
    %15 = vector.extract_strided_slice %0 {offsets = [0, 9], sizes = [32, 1], strides = [1, 1]} : vector<32x16xf32> to vector<32x1xf32>
    %16 = vector.broadcast %15 : vector<32x1xf32> to vector<32x128xf32>
    %17 = arith.addf %14, %16 : vector<32x128xf32>
    %cst_8 = arith.constant 0.00999999977 : f32
    %18 = vector.broadcast %cst_8 : f32 to vector<32x128xf32>
    %19 = arith.mulf %18, %17 : vector<32x128xf32>
    %20 = arith.maximumf %17, %19 : vector<32x128xf32>
    %c1 = arith.constant 1 : index
    %c0_9 = arith.constant 0 : index
    %c0_10 = arith.constant 0 : index
    %21 = vector.load %arg2[%c1, %c0_9, %c0_10] : memref<3x32x32xf32, #tpu.memory_space<vmem>>, vector<1x32x32xf32>
    %22 = vector.shape_cast %21 : vector<1x32x32xf32> to vector<32x32xf32>
    %23 = arith.truncf %22 : vector<32x32xf32> to vector<32x32xbf16>
    %24 = arith.truncf %20 : vector<32x128xf32> to vector<32x128xbf16>
    %cst_11 = arith.constant dense<0.000000e+00> : vector<32x128xf32>
    %25 = tpu.matmul %23, %24, %cst_11 {dimension_numbers = #tpu.dot_dimension_numbers<[1], [0], [0], [1], [0, 0, 1, 1], [], []>} : vector<32x32xbf16>, vector<32x128xbf16>, vector<32x128xf32> -> vector<32x128xf32>
    %26 = vector.extract_strided_slice %0 {offsets = [0, 10], sizes = [32, 1], strides = [1, 1]} : vector<32x16xf32> to vector<32x1xf32>
    %27 = vector.broadcast %26 : vector<32x1xf32> to vector<32x128xf32>
    %28 = arith.addf %25, %27 : vector<32x128xf32>
    %cst_12 = arith.constant 0.00999999977 : f32
    %29 = vector.broadcast %cst_12 : f32 to vector<32x128xf32>
    %30 = arith.mulf %29, %28 : vector<32x128xf32>
    %31 = arith.maximumf %28, %30 : vector<32x128xf32>
    %c2 = arith.constant 2 : index
    %c0_13 = arith.constant 0 : index
    %c0_14 = arith.constant 0 : index
    %32 = vector.load %arg2[%c2, %c0_13, %c0_14] : memref<3x32x32xf32, #tpu.memory_space<vmem>>, vector<1x32x32xf32>
    %33 = vector.shape_cast %32 : vector<1x32x32xf32> to vector<32x32xf32>
    %34 = arith.truncf %33 : vector<32x32xf32> to vector<32x32xbf16>
    %35 = arith.truncf %31 : vector<32x128xf32> to vector<32x128xbf16>
    %cst_15 = arith.constant dense<0.000000e+00> : vector<32x128xf32>
    %36 = tpu.matmul %34, %35, %cst_15 {dimension_numbers = #tpu.dot_dimension_numbers<[1], [0], [0], [1], [0, 0, 1, 1], [], []>} : vector<32x32xbf16>, vector<32x128xbf16>, vector<32x128xf32> -> vector<32x128xf32>
    %37 = vector.extract_strided_slice %0 {offsets = [0, 11], sizes = [32, 1], strides = [1, 1]} : vector<32x16xf32> to vector<32x1xf32>
    %38 = vector.broadcast %37 : vector<32x1xf32> to vector<32x128xf32>
    %39 = arith.addf %36, %38 : vector<32x128xf32>
    %cst_16 = arith.constant 0.00999999977 : f32
    %40 = vector.broadcast %cst_16 : f32 to vector<32x128xf32>
    %41 = arith.mulf %40, %39 : vector<32x128xf32>
    %42 = arith.maximumf %39, %41 : vector<32x128xf32>
    %43 = vector.extract_strided_slice %0 {offsets = [0, 12], sizes = [32, 1], strides = [1, 1]} : vector<32x16xf32> to vector<32x1xf32>
    %44 = vector.extract_strided_slice %0 {offsets = [0, 13], sizes = [1, 1], strides = [1, 1]} : vector<32x16xf32> to vector<1x1xf32>
    %45 = vector.broadcast %43 : vector<32x1xf32> to vector<32x128xf32>
    %46 = arith.mulf %42, %45 : vector<32x128xf32>
    %cst_17 = arith.constant dense<0.000000e+00> : vector<128xf32>
    %47 = vector.multi_reduction <add>, %46, %cst_17 [0] : vector<32x128xf32> to vector<128xf32>
    %48 = vector.shape_cast %47 : vector<128xf32> to vector<1x128xf32>
    %49 = vector.broadcast %44 : vector<1x1xf32> to vector<1x128xf32>
    %50 = arith.addf %48, %49 : vector<1x128xf32>
    %c0_18 = arith.constant 0 : index
    %c0_19 = arith.constant 0 : index
    %51 = vector.load %arg4[%c0_18, %c0_19] : memref<1x128xf32, #tpu.memory_space<vmem>>, vector<1x128xf32>
    tpu.vector_store %arg4[%c0_18, %c0_19], %50 {strides = array<i32>} : memref<1x128xf32, #tpu.memory_space<vmem>>, vector<1x128xf32>,
    return
  }
  func.func @transform_0(%arg0: i32) -> (i32, i32) {
    %c0_i32 = arith.constant 0 : i32
    %c0_i32_0 = arith.constant 0 : i32
    return %c0_i32, %arg0 : i32, i32
  }
  func.func @transform_1(%arg0: i32) -> (i32, i32, i32) {
    %c0_i32 = arith.constant 0 : i32
    %c0_i32_0 = arith.constant 0 : i32
    %c0_i32_1 = arith.constant 0 : i32
    %c0_i32_2 = arith.constant 0 : i32
    return %c0_i32, %c0_i32_0, %c0_i32_1 : i32, i32, i32
  }
  func.func @transform_2(%arg0: i32) -> (i32, i32) {
    %c0_i32 = arith.constant 0 : i32
    %c0_i32_0 = arith.constant 0 : i32
    %c0_i32_1 = arith.constant 0 : i32
    return %c0_i32, %c0_i32_0 : i32, i32
  }
  func.func @transform_3(%arg0: i32) -> (i32, i32) {
    %c0_i32 = arith.constant 0 : i32
    %c0_i32_0 = arith.constant 0 : i32
    return %c0_i32, %arg0 : i32, i32
  }
}

</mosaic_0001>

<bundles_post_ra>
// kernel: tpu_custom_call.1
= control target key start
LH: loop header
LB: loop body
LE: loop exit
PB: predicated region body
PF: predicated region fallthrough
CT: control target
= control target key end

     0   :  { %8 = vsyncpa [#allocation3], 0  ;;  %s685_s0 = inlined_call_operand.vmem [shape: f32[8,128], index: 0, kind: input, shape index: {}]   ;;  %s686_s1 = inlined_call_operand.hbm [shape: f32[3,32,32], index: 1, kind: input, shape index: {}]   ;;  %s687_s2 = inlined_call_operand.vmem [shape: f32[32,16], index: 2, kind: input, shape index: {}]   ;;  %s688_s3 = inlined_call_operand.hbm [shape: f32[1,128], index: 3, kind: output, shape index: {}]  }
   0x1   :  { %9 = vsyncpa [#allocation4], 0  ;;  %s595_s12 = smov [#allocation2]  }
   0x2   :  { %s17_s13 = sshll.u32 %s595_s12, 4  ;;  %s18_s13 = int_to_ptr.vmem [resolvable:$true] %s17_s13 }
   0x3   :  { %s559_s14 = scalar_lea.vmem %s18_s13, 1536  ;;  %p564_p1 = scmp.lt.s32.totalorder %s18_s13, %s18_s13 }
   0x4   :  { %p560_p0 = scmp.ne.s32.totalorder %s18_s13, %s559_s14  ;;  %p565_p2 = scmp.lt.s32.totalorder %s559_s14, %s559_s14 }
   0x6   :  { %p566_p3 = por %p565_p2, %p564_p1 }
   0x8   :  { %p567_p4 = pnand %p566_p3, %p560_p0 }
   0xa   :  { %570 = shalt.err (!%p567_p4)
}
   0xb   :  { %s596_s15 = smov 128   ;;  %s597_s16 = smov 8  }
   0xc   :  { %23 = dma.hbm_to_vmem [thread:$0]  %s686_s1, 1536, %s18_s13, [#allocation3], %s596_s15, %s596_s15, %s597_s16  }
   0xd   :  { %591 = dma.done.wait [#allocation3], 1536  }
   0xe   :  { %592 = vsyncadd [#allocation3], 4294965760  ;;  %v598_v0 = vmov 8   ;;  %vm55_vm0 = vcmask 64512   ;;  %v34_v1 = vld [vmem:[%s685_s0] sm:$0xff]  ;;  %v639_v3 = vld [vmem:[%s687_s2 + $0x8] sm:$0xff] }
   0xf   :  { %541 = vset.pattern.permute.xlu1 %v598_v0  ;;  %540 = vset.pattern.permute.xlu0 %v598_v0  ;;  %v634_v2 = vld [vmem:[%s687_s2] sm:$0xff]  ;;  %v645_v4 = vld [vmem:[%s687_s2 + $0x10] sm:$0xff]  ;;  %v654_v5 = vld [vmem:[%s687_s2 + $0x18] sm:$0xff]  ;;  %vm181_vm1 = vcmask 261120   ;;  %v599_v9 = vmov 9   ;;  %v600_v38 = vmov 10  }
  0x10   :  { %498 = vmatprep.subr.mxu0 %v34_v1  ;;  %500 = vmatprep.mubr.msk.f32.mxu0 %vm55_vm0, %v634_v2  ;;  %v157_v6 = vld [vmem:[#allocation2] sm:$0xff]  ;;  %v158_v7 = vld [vmem:[#allocation2 + $0x8] sm:$0xff]  ;;  %v159_v32 = vld [vmem:[#allocation2 + $0x10] sm:$0xff]  ;;  %s604_s2 = smov [#allocation5]  }
  0x11   :  { %499 = vmatpush3.msra.mxu0 %v34_v1  ;;  %37 = vperm.xlu1 %541, %v634_v2   ;;  %v161_v8 = vpack.c.bf16 %v158_v7, %v157_v6  ;;  %v160_v33 = vld [vmem:[#allocation2 + $0x18] sm:$0xff]  ;;  %v246_v35 = vld [vmem:[#allocation2 + $0x20] sm:$0xff]  ;;  %v247_v36 = vld [vmem:[#allocation2 + $0x28] sm:$0xff]  ;;  %v601_v7 = vmov 11   ;;  %s462_s27 = sshll.u32 %s604_s2, 4  ;;  %s463_s27 = int_to_ptr.vmem [resolvable:$true] %s462_s27 }
  0x12   :  { %501 = vmatmul.mubr.msk.f32.vlgmr.msra.gmra.mxu0 %vm55_vm0, %v639_v3  ;;  %47 = vperm.xlu0 %540, %v645_v4   ;;  %v162_v34 = vpack.c.bf16 %v160_v33, %v159_v32  ;;  %v250_v37 = vpack.c.bf16 %v247_v36, %v246_v35  ;;  %v248_v61 = vld [vmem:[#allocation2 + $0x30] sm:$0xff]  ;;  %v249_v62 = vld [vmem:[#allocation2 + $0x38] sm:$0xff]  ;;  %v334_v0 = vld [vmem:[#allocation2 + $0x40] sm:$0xff]  ;;  %s571_s28 = scalar_lea.vmem %s463_s27, 16  ;;  %s575_s29 = scalar_lea.vmem %s463_s27, 32 }
  0x13   :  { %503 = vmatprep.mubr.msk.f32.mxu0 %vm55_vm0, %v645_v4  ;;  %510 = vmatprep.mubr.msk.bf16.mxu1 %vm181_vm1, %v161_v8  ;;  %v251_v63 = vpack.c.bf16 %v249_v62, %v248_v61  ;;  %v335_v1 = vld [vmem:[#allocation2 + $0x48] sm:$0xff]  ;;  %v602_v8 = vmov 12   ;;  %p572_p5 = scmp.ne.s32.totalorder %s463_s27, %s571_s28  ;;  %p576_p6 = scmp.lt.s32.totalorder %s463_s27, %s463_s27 }
  0x14   :  { %v338_v6 = vpack.c.bf16 %v335_v1, %v334_v0  ;;  %p577_p7 = scmp.lt.s32.totalorder %s575_s29, %s571_s28 }
  0x15   :  { %42 = vperm.xlu1 %541, %v639_v3  }
  0x16   :  { %504 = vmatmul.mubr.msk.f32.gmra.mxu0 %vm55_vm0, %v654_v5  ;;  %52 = vperm.xlu0 %540, %v654_v5   ;;  %p578_p8 = por %p577_p7, %p576_p6 }
  0x17   :  { %518 = vmatprep.mubr.msk.bf16.mxu0 %vm181_vm1, %v250_v37 }
  0x18   :  { %p579_p9 = pnand %p578_p8, %p572_p5 }
  0x19   :  { %543 = vset.pattern.permute.xlu1 %v599_v9 }
  0x1a   :  { %542 = vset.pattern.permute.xlu0 %v599_v9  ;;  %178 = vperm.xlu1 %543, %v654_v5   ;;  %v603_v9 = vmov 13  }
  0x1b   :  { %174 = vperm.xlu0 %542, %v645_v4  }
  0x1e   :  { %166 = vperm.xlu1 %543, %v634_v2  }
  0x1f   :  { %170 = vperm.xlu0 %542, %v639_v3  }
  0x22   :  { %544 = vset.pattern.permute.xlu1 %v600_v38 }
  0x23   :  { %545 = vset.pattern.permute.xlu0 %v600_v38  ;;  %263 = vperm.xlu1 %544, %v645_v4  }
  0x24   :  { %267 = vperm.xlu0 %545, %v654_v5  }
  0x27   :  { %255 = vperm.xlu1 %544, %v634_v2  }
  0x28   :  { %546 = vset.pattern.permute.xlu0 %v601_v7 }
  0x29   :  { %343 = vperm.xlu0 %546, %v634_v2  }
  0x2b   :  { %259 = vperm.xlu1 %544, %v639_v3  }
  0x2d   :  { %355 = vperm.xlu0 %546, %v654_v5  }
  0x2f   :  { %547 = vset.pattern.permute.xlu1 %v601_v7 }
  0x30   :  { %347 = vperm.xlu1 %547, %v639_v3  }
  0x31   :  { %549 = vset.pattern.permute.xlu0 %v602_v8 }
  0x32   :  { %426 = vperm.xlu0 %549, %v639_v3  }
  0x34   :  { %351 = vperm.xlu1 %547, %v645_v4  }
  0x36   :  { %550 = vset.pattern.permute.xlu0 %v603_v9 }
  0x37   :  { %451 = vperm.xlu0 %550, %v634_v2  }
  0x38   :  { %548 = vset.pattern.permute.xlu1 %v602_v8 }
  0x39   :  { %422 = vperm.xlu1 %548, %v634_v2  }
  0x3d   :  { %430 = vperm.xlu1 %548, %v645_v4  }
  0x41   :  { %434 = vperm.xlu1 %548, %v654_v5  }
  0x8c   :  { %v38_v10 = vpop.permute.xlu1 %37 }
  0x8d   :  { %v48_v11 = vpop.permute.xlu0 %47 }
  0x90   :  { %v43_v13 = vpop.permute.xlu1 %42 }
  0x91   :  { %v53_v16 = vpop.permute.xlu0 %52 }
  0x95   :  { %v179_v39 = vpop.permute.xlu1 %178 }
  0x96   :  { %v175_v40 = vpop.permute.xlu0 %174 }
  0x99   :  { %v167_v42 = vpop.permute.xlu1 %166 }
  0x9a   :  { %v171_v49 = vpop.permute.xlu0 %170 }
  0xd2   :  { %v502_v12 = vpop.f32.mrf.mxu0 }
  0xd3   :  { %v136_v18 = vadd.f32 %v502_v12, %v43_v13 }
  0xd4   :  { %v130_v14 = vpop.f32.mrf.mxu0 }
  0xd5   :  { %v131_v15 = vadd.f32 %v130_v14, %v38_v10  ;;  %v150_v24 = vmul.f32 0.01, %v136_v18  ;;  %v264_v10 = vpop.permute.xlu1 %263 }
  0xd6   :  { %v505_v17 = vpop.f32.mrf.mxu0 }
  0xd7   :  { %v146_v19 = vadd.f32 %v505_v17, %v53_v16  ;;  %v149_v21 = vmul.f32 0.01, %v131_v15  ;;  %v154_v29 = vmax.f32 %v136_v18, %v150_v24 }
  0xd8   :  { %v140_v20 = vpop.f32.mrf.mxu0 }
  0xd9   :  { %v152_v22 = vmul.f32 0.01, %v146_v19  ;;  %v141_v23 = vadd.f32 %v140_v20, %v48_v11  ;;  %v153_v26 = vmax.f32 %v131_v15, %v149_v21  ;;  %v256_v11 = vpop.permute.xlu1 %255  ;;  %v268_v15 = vpop.permute.xlu0 %267 }
  0xdb   :  { %v151_v25 = vmul.f32 0.01, %v141_v23  ;;  %v156_v27 = vmax.f32 %v146_v19, %v152_v22  ;;  %v163_v31 = vpack.c.bf16 %v154_v29, %v153_v26  ;;  %v337_v29 = vld [vmem:[#allocation2 + $0x58] sm:$0xff] }
  0xdd   :  { %v155_v28 = vmax.f32 %v141_v23, %v151_v25  ;;  %v260_v20 = vpop.permute.xlu1 %259  ;;  %v344_v32 = vpop.permute.xlu0 %343 }
  0xdf   :  { %v164_v30 = vpack.c.bf16 %v156_v27, %v155_v28  ;;  %v336_v28 = vld [vmem:[#allocation2 + $0x50] sm:$0xff] }
  0xe1   :  { %506 = vmatprep.subr.bf16.mxu1 %v164_v30  ;;  %v356_v36 = vpop.permute.xlu0 %355 }
  0xe2   :  { %507 = vmatpush3.bf16.msra.mxu1 %v164_v30  ;;  %v339_v30 = vpack.c.bf16 %v337_v29, %v336_v28 }
  0xe3   :  { %508 = vmatprep.subr.bf16.mxu1 %v163_v31 }
  0xe6   :  { %509 = vmatpush3.bf16.msra.mxu1 %v163_v31  ;;  %v348_v31 = vpop.permute.xlu1 %347 }
  0xe9   :  { %511 = vmatmul.mubr.msk.bf16.vlgmr.msra.gmra.mxu1 %vm181_vm1, %v162_v34 }
  0xea   :  { %526 = vmatprep.mubr.msk.bf16.mxu1 %vm181_vm1, %v338_v6  ;;  %v352_v33 = vpop.permute.xlu1 %351 }
 0x1a9   :  { %v512_v41 = vpop.f32.mrf.mxu1 }
 0x1aa   :  { %v231_v43 = vadd.f32 %v512_v41, %v175_v40 }
 0x1ab   :  { %v222_v44 = vpop.f32.mrf.mxu1 }
 0x1ac   :  { %v223_v45 = vadd.f32 %v222_v44, %v167_v42  ;;  %v239_v47 = vmul.f32 0.01, %v231_v43 }
 0x1ad   :  { %v513_v46 = vpop.f32.mrf.mxu1 }
 0x1ae   :  { %v234_v48 = vadd.f32 %v513_v46, %v179_v39  ;;  %v237_v51 = vmul.f32 0.01, %v223_v45  ;;  %v243_v54 = vmax.f32 %v231_v43, %v239_v47  ;;  %v423_v39 = vpop.permute.xlu1 %422 }
 0x1af   :  { %v225_v50 = vpop.f32.mrf.mxu1 }
 0x1b0   :  { %v240_v52 = vmul.f32 0.01, %v234_v48  ;;  %v226_v53 = vadd.f32 %v225_v50, %v171_v49  ;;  %v241_v57 = vmax.f32 %v223_v45, %v237_v51  ;;  %v427_v50 = vpop.permute.xlu0 %426 }
 0x1b2   :  { %v244_v55 = vmax.f32 %v234_v48, %v240_v52  ;;  %v238_v56 = vmul.f32 0.01, %v226_v53  ;;  %v431_v49 = vpop.permute.xlu1 %430 }
 0x1b4   :  { %v242_v58 = vmax.f32 %v226_v53, %v238_v56  ;;  %v253_v59 = vpack.c.bf16 %v244_v55, %v243_v54  ;;  %v452_v7 = vpop.permute.xlu0 %451 }
 0x1b6   :  { %514 = vmatprep.subr.bf16.mxu0 %v253_v59  ;;  %v252_v60 = vpack.c.bf16 %v242_v58, %v241_v57  ;;  %v435_v58 = vpop.permute.xlu1 %434 }
 0x1b7   :  { %515 = vmatpush3.bf16.msra.mxu0 %v253_v59 }
 0x1b8   :  { %516 = vmatprep.subr.bf16.mxu0 %v252_v60 }
 0x1bb   :  { %517 = vmatpush3.bf16.msra.mxu0 %v252_v60 }
 0x1be   :  { %519 = vmatmul.mubr.msk.bf16.vlgmr.msra.gmra.mxu0 %vm181_vm1, %v251_v63 }
 0x27e   :  { %v520_v12 = vpop.f32.mrf.mxu0 }
 0x27f   :  { %v319_v13 = vadd.f32 %v520_v12, %v264_v10 }
 0x280   :  { %v310_v14 = vpop.f32.mrf.mxu0 }
 0x281   :  { %v311_v16 = vadd.f32 %v310_v14, %v256_v11  ;;  %v327_v18 = vmul.f32 0.01, %v319_v13 }
 0x282   :  { %v521_v17 = vpop.f32.mrf.mxu0 }
 0x283   :  { %v322_v19 = vadd.f32 %v521_v17, %v268_v15  ;;  %v325_v21 = vmul.f32 0.01, %v311_v16  ;;  %v331_v23 = vmax.f32 %v319_v13, %v327_v18 }
 0x284   :  { %v313_v3 = vpop.f32.mrf.mxu0 }
 0x285   :  { %v328_v4 = vmul.f32 0.01, %v322_v19  ;;  %v314_v22 = vadd.f32 %v313_v3, %v260_v20  ;;  %v329_v25 = vmax.f32 %v311_v16, %v325_v21 }
 0x287   :  { %v332_v24 = vmax.f32 %v322_v19, %v328_v4  ;;  %v326_v2 = vmul.f32 0.01, %v314_v22 }
 0x289   :  { %v330_v5 = vmax.f32 %v314_v22, %v326_v2  ;;  %v341_v26 = vpack.c.bf16 %v332_v24, %v331_v23 }
 0x28b   :  { %522 = vmatprep.subr.bf16.mxu1 %v341_v26  ;;  %v340_v27 = vpack.c.bf16 %v330_v5, %v329_v25 }
 0x28c   :  { %523 = vmatpush3.bf16.msra.mxu1 %v341_v26 }
 0x28d   :  { %524 = vmatprep.subr.bf16.mxu1 %v340_v27 }
 0x290   :  { %525 = vmatpush3.bf16.msra.mxu1 %v340_v27 }
 0x293   :  { %527 = vmatmul.mubr.msk.bf16.vlgmr.msra.gmra.mxu1 %vm181_vm1, %v339_v30 }
 0x353   :  { %v528_v34 = vpop.f32.mrf.mxu1 }
 0x354   :  { %v407_v37 = vadd.f32 %v528_v34, %v352_v33 }
 0x355   :  { %v398_v35 = vpop.f32.mrf.mxu1 }
 0x356   :  { %v399_v38 = vadd.f32 %v398_v35, %v344_v32  ;;  %v415_v44 = vmul.f32 0.01, %v407_v37 }
 0x357   :  { %v529_v40 = vpop.f32.mrf.mxu1 }
 0x358   :  { %v413_v41 = vmul.f32 0.01, %v399_v38  ;;  %v410_v42 = vadd.f32 %v529_v40, %v356_v36  ;;  %v419_v51 = vmax.f32 %v407_v37, %v415_v44 }
 0x359   :  { %v401_v43 = vpop.f32.mrf.mxu1 }
 0x35a   :  { %v402_v45 = vadd.f32 %v401_v43, %v348_v31  ;;  %v417_v46 = vmax.f32 %v399_v38, %v413_v41  ;;  %v416_v47 = vmul.f32 0.01, %v410_v42  ;;  %v439_v56 = vmul.f32 %v431_v49, %v419_v51 }
 0x35c   :  { %v414_v48 = vmul.f32 0.01, %v402_v45  ;;  %v420_v53 = vmax.f32 %v410_v42, %v416_v47  ;;  %v437_v54 = vmul.f32 %v423_v39, %v417_v46 }
 0x35e   :  { %v418_v52 = vmax.f32 %v402_v45, %v414_v48  ;;  %v440_v59 = vmul.f32 %v435_v58, %v420_v53 }
 0x360   :  { %v438_v55 = vmul.f32 %v427_v50, %v418_v52 }
 0x362   :  { %v441_v57 = vadd.f32 %v438_v55, %v437_v54 }
 0x364   :  { %v442_v60 = vadd.f32 %v441_v57, %v439_v56 }
 0x366   :  { %v443_v61 = vadd.f32 %v442_v60, %v440_v59 }
 0x368   :  { %v444_v62 = vrot.slane %v443_v61, 4 }
 0x36a   :  { %v445_v63 = vadd.f32 %v444_v62, %v443_v61 }
 0x36c   :  { %v446_v0 = vrot.slane %v445_v63, 2 }
 0x36e   :  { %v447_v1 = vadd.f32 %v446_v0, %v445_v63 }
 0x370   :  { %v448_v6 = vrot.slane %v447_v1, 1 }
 0x372   :  { %v449_v8 = vadd.f32 %v448_v6, %v447_v1 }
 0x374   :  { %v454_v9 = vadd.f32 %v452_v7, %v449_v8 }
 0x376   :  { %455 = vst [vmem:[#allocation5] sm:$0x1] %v454_v9 }
 0x377   :  { %582 = shalt.err (!%p579_p9)
}
 0x378   :  { %465 = dma.vmem_to_hbm [thread:$0]  %s463_s27, 16, %s688_s3, [#allocation4]  }
 0x379   :  { %593 = dma.done.wait [#allocation4], 16  }
 0x37a   :  { %594 = vsyncadd [#allocation4], 4294967280 }
 0x37b   :  { %469 = vsyncpa [#allocation3], 1 }
 0x37c   :  { %470 = vsyncpa [#allocation4], 1 }

</bundles_post_ra>
